<compile_context>
chip_gen: v5e
topology: v5e:2x2
jax: 0.10.0
libtpu: 0.0.40
codegen_flags: <defaults>
</compile_context>

<pallas_src>
import jax
import jax.numpy as jnp
from jax.experimental import pallas as pl
from jax.experimental.pallas import tpu as pltpu

IN_FEATURES = 20
HIDDEN = 256
OUT_FEATURES = 10

N_PAD = 128   # W2 column padding only (full-lane MXU output tile for the 2nd matmul)


def _round_up(x, m):
    return ((x + m - 1) // m) * m


def _cdiv(a, b):
    return -(-a // b)


def mlp_kernel(x_ref, w1_ref, b1_ref, w2_ref, b2_ref, o_ref):
    # x tile arrives as raw f32 from HBM; cast to bf16 in-kernel (VPU filler).
    x = x_ref[...].astype(jnp.bfloat16)                                  # (tb, 20)
    # First matmul on the MXU, f32 accumulation (compiler handles K=20 padding).
    h = jnp.dot(x, w1_ref[...], preferred_element_type=jnp.float32)     # (tb, 256)
    # Epilogue (bias + ReLU) in f32 on the accumulator (v5e-safe).
    h = jnp.maximum(h + b1_ref[...], 0.0)
    # Second matmul against the 128-lane padded W2 (full MXU tile), f32 accumulate.
    y = jnp.dot(h.astype(jnp.bfloat16), w2_ref[...],
                preferred_element_type=jnp.float32)                      # (tb, 128)
    # Store only the 10 real output columns -> narrow HBM writeback.
    o_ref[...] = (y[:, :OUT_FEATURES] + b2_ref[...]).astype(o_ref.dtype)


def mlp_forward(x, w1, b1, w2, b2, *, tile_b_max=4096):
    """x: (B, 20) f32; w1: (20, 256); b1: (1, 256); w2: (256, 10); b2: (1, 10)."""
    B, K = x.shape
    H = w1.shape[1]
    N = w2.shape[1]

    # --- batch tiling: large tiles to amortize per-step overhead, bounded padding
    # waste, and >=2 grid steps for large B so both v7x TensorCores get work. ---
    num_tiles = max(1, _cdiv(B, tile_b_max))
    if num_tiles == 1 and B > 1024:
        num_tiles = 2
    tile_b = _round_up(_cdiv(B, num_tiles), 8)
    b_pad = tile_b * num_tiles
    grid = (num_tiles,)

    # Weights/biases are tiny: cast/pad once outside (zero columns of W2 contribute 0).
    w1_b = w1.astype(jnp.bfloat16)                                    # (20, 256)
    w2_p = jnp.pad(w2.astype(jnp.bfloat16), ((0, 0), (0, N_PAD - N)))  # (256, 128)
    b1_f = b1.astype(jnp.float32)                                     # (1, 256)
    b2_f = b2.astype(jnp.float32)                                     # (1, 10)

    # Only pad batch rows when needed (no lane padding of x; kernel takes f32 directly).
    x_in = x if b_pad == B else jnp.pad(x, ((0, b_pad - B), (0, 0)))

    # VMEM budget from actual footprint (double-buffered tiles + in-kernel temporaries),
    # clamped well below v7x's 64 MiB physical VMEM.
    footprint = (
        2 * tile_b * IN_FEATURES * 4        # x tile (f32), double-buffered
        + 2 * tile_b * OUT_FEATURES * 4     # output tile (f32), double-buffered
        + tile_b * IN_FEATURES * 2          # bf16 x copy
        + tile_b * HIDDEN * 4               # hidden f32
        + tile_b * HIDDEN * 2               # hidden bf16
        + tile_b * N_PAD * 4                # padded second-matmul accumulator
        + 2 * (IN_FEATURES * HIDDEN * 2 + HIDDEN * 4
               + HIDDEN * N_PAD * 2 + OUT_FEATURES * 4)   # resident weights/biases
    )
    vmem_limit = int(min(48 << 20, max(16 << 20, 2 * footprint)))

    cost = pl.CostEstimate(
        flops=2 * b_pad * (IN_FEATURES * HIDDEN + HIDDEN * N_PAD),
        transcendentals=0,
        bytes_accessed=b_pad * (IN_FEATURES + OUT_FEATURES) * 4
        + IN_FEATURES * HIDDEN * 2 + HIDDEN * N_PAD * 2 + HIDDEN * 4 + OUT_FEATURES * 4,
    )

    out = pl.pallas_call(
        mlp_kernel,
        out_shape=jax.ShapeDtypeStruct((b_pad, OUT_FEATURES), jnp.float32),
        grid=grid,
        in_specs=[
            pl.BlockSpec((tile_b, IN_FEATURES), lambda i: (i, 0)),  # x tile, pipelined
            pl.BlockSpec((IN_FEATURES, H), lambda i: (0, 0)),       # W1 resident
            pl.BlockSpec((1, H), lambda i: (0, 0)),                 # b1 resident
            pl.BlockSpec((H, N_PAD), lambda i: (0, 0)),             # W2 resident (padded)
            pl.BlockSpec((1, OUT_FEATURES), lambda i: (0, 0)),      # b2 resident
        ],
        out_specs=pl.BlockSpec((tile_b, OUT_FEATURES), lambda i: (i, 0)),
        compiler_params=pltpu.CompilerParams(
            dimension_semantics=("parallel",),   # megacore-shard batch on v7x
            vmem_limit_bytes=vmem_limit,
        ),
        cost_estimate=cost,
    )(x_in, w1_b, b1_f, w2_p, b2_f)

    return out if b_pad == B else out[:B]


def init_params(key):
    # Deterministic init mimicking PyTorch's default Linear init:
    # uniform(-1/sqrt(fan_in), 1/sqrt(fan_in)) for weights and biases.
    k1, k2, k3, k4 = jax.random.split(key, 4)
    in1, h, out = IN_FEATURES, HIDDEN, OUT_FEATURES
    bound1 = 1.0 / jnp.sqrt(in1)
    bound2 = 1.0 / jnp.sqrt(h)
    w1 = jax.random.uniform(k1, (in1, h), jnp.float32, -bound1, bound1)
    b1 = jax.random.uniform(k2, (1, h), jnp.float32, -bound1, bound1)
    w2 = jax.random.uniform(k3, (h, out), jnp.float32, -bound2, bound2)
    b2 = jax.random.uniform(k4, (1, out), jnp.float32, -bound2, bound2)
    return w1, b1, w2, b2


if __name__ == "__main__":
    key = jax.random.PRNGKey(0)
    kx, kp = jax.random.split(key)

    batch = 8
    x = jax.random.normal(kx, (batch, IN_FEATURES), jnp.float32)
    w1, b1, w2, b2 = init_params(kp)

    y = mlp_forward(x, w1, b1, w2, b2)
    jax.block_until_ready(y)

    # Reference check (plain JAX, f32). Tolerance loosened because the kernel
    # feeds the MXU bf16 operands (f32 accumulation).
    h_ref = jnp.maximum(x @ w1 + b1, 0.0)
    y_ref = h_ref @ w2 + b2
    assert y.shape == (batch, OUT_FEATURES)
    assert jnp.allclose(y, y_ref, atol=2e-2, rtol=2e-2), (
        f"max abs err = {jnp.max(jnp.abs(y - y_ref))}")

    print("KERNEL_OK")
</pallas_src>

<mosaic_0001>
module attributes {stable_mosaic.version = 11 : i64} {
  func.func @mlp_kernel(%arg0: i32, %arg1: memref<8x20xf32, #tpu.memory_space<vmem>>, %arg2: memref<20x256xbf16, #tpu.memory_space<vmem>>, %arg3: memref<1x256xf32, #tpu.memory_space<vmem>>, %arg4: memref<256x128xbf16, #tpu.memory_space<vmem>>, %arg5: memref<1x10xf32, #tpu.memory_space<vmem>>, %arg6: memref<8x10xf32, #tpu.memory_space<vmem>>) attributes {dimension_semantics = [#tpu.dimension_semantics<parallel>], iteration_bounds = array<i64: 1>, scalar_prefetch = 0 : i64, scratch_operands = 0 : i64, tpu.core_type = #tpu.core_type<tc>, window_params = [{transform_indices = @transform_0, window_bounds = array<i64: 8, 20>}, {pipeline_mode = #tpu.pipeline_mode<synchronous>, transform_indices = @transform_1, window_bounds = array<i64: 20, 256>}, {pipeline_mode = #tpu.pipeline_mode<synchronous>, transform_indices = @transform_2, window_bounds = array<i64: 1, 256>}, {pipeline_mode = #tpu.pipeline_mode<synchronous>, transform_indices = @transform_3, window_bounds = array<i64: 256, 128>}, {pipeline_mode = #tpu.pipeline_mode<synchronous>, transform_indices = @transform_4, window_bounds = array<i64: 1, 10>}, {transform_indices = @transform_5, window_bounds = array<i64: 8, 10>}]} {
    %c0 = arith.constant 0 : index
    %c0_0 = arith.constant 0 : index
    %0 = vector.load %arg1[%c0, %c0_0] : memref<8x20xf32, #tpu.memory_space<vmem>>, vector<8x20xf32>
    %1 = arith.truncf %0 : vector<8x20xf32> to vector<8x20xbf16>
    %c0_1 = arith.constant 0 : index
    %c0_2 = arith.constant 0 : index
    %2 = vector.load %arg2[%c0_1, %c0_2] : memref<20x256xbf16, #tpu.memory_space<vmem>>, vector<20x256xbf16>
    %cst = arith.constant dense<0.000000e+00> : vector<8x256xf32>
    %3 = tpu.matmul %1, %2, %cst {dimension_numbers = #tpu.dot_dimension_numbers<[1], [0], [0], [1], [0, 0, 1, 1], [], []>} : vector<8x20xbf16>, vector<20x256xbf16>, vector<8x256xf32> -> vector<8x256xf32>
    %c0_3 = arith.constant 0 : index
    %c0_4 = arith.constant 0 : index
    %4 = vector.load %arg3[%c0_3, %c0_4] : memref<1x256xf32, #tpu.memory_space<vmem>>, vector<1x256xf32>
    %5 = vector.broadcast %4 : vector<1x256xf32> to vector<8x256xf32>
    %6 = arith.addf %3, %5 : vector<8x256xf32>
    %cst_5 = arith.constant 0.000000e+00 : f32
    %7 = vector.broadcast %cst_5 : f32 to vector<8x256xf32>
    %8 = arith.maximumf %6, %7 : vector<8x256xf32>
    %9 = arith.truncf %8 : vector<8x256xf32> to vector<8x256xbf16>
    %c0_6 = arith.constant 0 : index
    %c0_7 = arith.constant 0 : index
    %10 = vector.load %arg4[%c0_6, %c0_7] : memref<256x128xbf16, #tpu.memory_space<vmem>>, vector<256x128xbf16>
    %cst_8 = arith.constant dense<0.000000e+00> : vector<8x128xf32>
    %11 = tpu.matmul %9, %10, %cst_8 {dimension_numbers = #tpu.dot_dimension_numbers<[1], [0], [0], [1], [0, 0, 1, 1], [], []>} : vector<8x256xbf16>, vector<256x128xbf16>, vector<8x128xf32> -> vector<8x128xf32>
    %12 = vector.extract_strided_slice %11 {offsets = [0, 0], sizes = [8, 10], strides = [1, 1]} : vector<8x128xf32> to vector<8x10xf32>
    %c0_9 = arith.constant 0 : index
    %c0_10 = arith.constant 0 : index
    %13 = vector.load %arg5[%c0_9, %c0_10] : memref<1x10xf32, #tpu.memory_space<vmem>>, vector<1x10xf32>
    %14 = vector.broadcast %13 : vector<1x10xf32> to vector<8x10xf32>
    %15 = arith.addf %12, %14 : vector<8x10xf32>
    %c0_11 = arith.constant 0 : index
    %c0_12 = arith.constant 0 : index
    %16 = vector.load %arg6[%c0_11, %c0_12] : memref<8x10xf32, #tpu.memory_space<vmem>>, vector<8x10xf32>
    tpu.vector_store %arg6[%c0_11, %c0_12], %15 {strides = array<i32>} : memref<8x10xf32, #tpu.memory_space<vmem>>, vector<8x10xf32>,
    return
  }
  func.func @transform_0(%arg0: i32) -> (i32, i32) {
    %c0_i32 = arith.constant 0 : i32
    %c0_i32_0 = arith.constant 0 : i32
    return %arg0, %c0_i32 : i32, i32
  }
  func.func @transform_1(%arg0: i32) -> (i32, i32) {
    %c0_i32 = arith.constant 0 : i32
    %c0_i32_0 = arith.constant 0 : i32
    %c0_i32_1 = arith.constant 0 : i32
    return %c0_i32, %c0_i32_0 : i32, i32
  }
  func.func @transform_2(%arg0: i32) -> (i32, i32) {
    %c0_i32 = arith.constant 0 : i32
    %c0_i32_0 = arith.constant 0 : i32
    %c0_i32_1 = arith.constant 0 : i32
    return %c0_i32, %c0_i32_0 : i32, i32
  }
  func.func @transform_3(%arg0: i32) -> (i32, i32) {
    %c0_i32 = arith.constant 0 : i32
    %c0_i32_0 = arith.constant 0 : i32
    %c0_i32_1 = arith.constant 0 : i32
    return %c0_i32, %c0_i32_0 : i32, i32
  }
  func.func @transform_4(%arg0: i32) -> (i32, i32) {
    %c0_i32 = arith.constant 0 : i32
    %c0_i32_0 = arith.constant 0 : i32
    %c0_i32_1 = arith.constant 0 : i32
    return %c0_i32, %c0_i32_0 : i32, i32
  }
  func.func @transform_5(%arg0: i32) -> (i32, i32) {
    %c0_i32 = arith.constant 0 : i32
    %c0_i32_0 = arith.constant 0 : i32
    return %arg0, %c0_i32 : i32, i32
  }
}

</mosaic_0001>

<bundles_post_ra>
// kernel: tpu_custom_call.1
= control target key start
LH: loop header
LB: loop body
LE: loop exit
PB: predicated region body
PF: predicated region fallthrough
CT: control target
= control target key end

     0   :  { %10 = vsyncpa [#allocation3], 0  ;;  %s615_s0 = inlined_call_operand.hbm [shape: f32[8,20], index: 0, kind: input, shape index: {}]   ;;  %s616_s1 = inlined_call_operand.hbm [shape: bf16[20,256], index: 1, kind: input, shape index: {}]   ;;  %s617_s2 = inlined_call_operand.hbm [shape: f32[1,256], index: 2, kind: input, shape index: {}]   ;;  %s618_s3 = inlined_call_operand.hbm [shape: bf16[256,128], index: 3, kind: input, shape index: {}]   ;;  %s619_s4 = inlined_call_operand.vmem [shape: f32[1,10], index: 4, kind: input, shape index: {}]   ;;  %s620_s5 = inlined_call_operand.hbm [shape: f32[8,10], index: 5, kind: output, shape index: {}]  }
   0x1   :  { %11 = vsyncpa [#allocation6], 0 }
   0x2   :  { %12 = vsyncpa [#allocation9], 0  ;;  %s29_s20 = sshll.u32 %s616_s1, 4  ;;  %s30_s20 = int_to_ptr.hbm [resolvable:$true] %s29_s20 }
   0x3   :  { %13 = vsyncpa [#allocation4], 0  ;;  %s558_s21 = smov [#allocation5]   ;;  %s19_s25 = sshll.u32 %s615_s0, 4  ;;  %s20_s25 = int_to_ptr.hbm [resolvable:$true] %s19_s25 }
   0x4   :  { %s31_s22 = sshll.u32 %s558_s21, 4  ;;  %s559_s26 = smov 128   ;;  %s32_s22 = int_to_ptr.vmem [resolvable:$true] %s31_s22 }
   0x5   :  { %s560_s27 = smov 8   ;;  %s561_s28 = smov [#allocation2]  }
   0x6   :  { %37 = dma.hbm_to_vmem [thread:$0]  %s30_s20, 384, %s32_s22, [#allocation6], %s559_s26, %s559_s26, %s560_s27  }
   0x7   :  { %s21_s29 = sshll.u32 %s561_s28, 4  ;;  %s43_s7 = sshll.u32 %s617_s2, 4  ;;  %s22_s29 = int_to_ptr.vmem [resolvable:$true] %s21_s29  ;;  %s44_s7 = int_to_ptr.hbm [resolvable:$true] %s43_s7 }
   0x8   :  { %24 = dma.hbm_to_vmem [thread:$0]  %s20_s25, 128, %s22_s29, [#allocation3]  }
   0x9   :  { %s53_s9 = sshll.u32 %s618_s3, 4  ;;  %s562_s10 = smov [#allocation7]   ;;  %s54_s9 = int_to_ptr.hbm [resolvable:$true] %s53_s9 }
   0xa   :  { %s45_s11 = sshll.u32 %s562_s10, 4  ;;  %s563_s0 = smov [#allocation8]   ;;  %s46_s11 = int_to_ptr.vmem [resolvable:$true] %s45_s11 }
   0xb   :  { %48 = dma.hbm_to_vmem [thread:$0]  %s44_s7, 32, %s46_s11, [#allocation6]  }
   0xc   :  { %s55_s12 = sshll.u32 %s563_s0, 4  ;;  %s564_s13 = smov 64   ;;  %s56_s12 = int_to_ptr.vmem [resolvable:$true] %s55_s12 }
   0xd   :  { %s565_s14 = smov 4  }
   0xe   :  { %61 = dma.hbm_to_vmem [thread:$0]  %s54_s9, 2048, %s56_s12, [#allocation9], %s564_s13, %s564_s13, %s565_s14  }
   0xf   :  { %550 = dma.done.wait [#allocation3], 128  }
  0x10   :  { %551 = vsyncadd [#allocation3], 4294967168 }
  0x11   :  { %552 = dma.done.wait [#allocation6], 416  }
  0x12   :  { %553 = vsyncadd [#allocation6], 4294966880 }
  0x13   :  { %554 = dma.done.wait [#allocation9], 2048  }
  0x14   :  { %555 = vsyncadd [#allocation9], 4294965248  ;;  %v85_v0 = vld [vmem:[#allocation5 + $0x10] sm:$0x33]  ;;  %vm111_vm0 = vcmask 1041408   ;;  %v81_v17 = vld [vmem:[#allocation2] sm:$0xff] }
  0x15   :  { %v99_v1 = vunpack.c.l.b16 %v85_v0  ;;  %v100_v2 = vunpack.c.h.b16 %v85_v0  ;;  %v330_v3 = vld [vmem:[#allocation5] sm:$0xf]  ;;  %v411_v4 = vld [vmem:[#allocation8 + $0x38] sm:$0xff]  ;;  %v403_v8 = vld [vmem:[#allocation5 + $0x4] sm:$0xf0]  ;;  %v82_v20 = vpack.c.bf16 %v81_v17, %v81_v17  ;;  %vm107_vm1 = vcmask 162816  }
  0x16   :  { %v419_v5 = vld [vmem:[#allocation8 + $0x78] sm:$0xff]  ;;  %v402_v9 = vld [vmem:[#allocation5 + $0x4] sm:$0xf]  ;;  %v332_v10 = vld [vmem:[#allocation5 + $0x8] sm:$0xf0]  ;;  %276 = vmatpush.bf16.msra.mxu2 %v411_v4  ;;  %v331_v15 = vor.u32 %v403_v8, %v330_v3  ;;  %s566_s15 = smov [#allocation10]  }
  0x17   :  { %v103_v6 = vpack.c.b16 %v99_v1, %v99_v1  ;;  %v104_v7 = vpack.c.b16 %v100_v2, %v100_v2  ;;  %289 = vmatpush.bf16.msra.mxu3 %v419_v5  ;;  %v410_v11 = vld [vmem:[#allocation8 + $0x30] sm:$0xff]  ;;  %v335_v16 = vor.u32 %v402_v9, %v332_v10  ;;  %v409_v18 = vld [vmem:[#allocation8 + $0x28] sm:$0xff]  ;;  %v408_v21 = vld [vmem:[#allocation8 + $0x20] sm:$0xff]  ;;  %s314_s16 = sshll.u32 %s566_s15, 4  ;;  %s316_s19 = sshll.u32 %s620_s5, 4  ;;  %vm307_vm2 = vcmask 80896   ;;  %s315_s16 = int_to_ptr.vmem [resolvable:$true] %s314_s16  ;;  %s317_s19 = int_to_ptr.hbm [resolvable:$true] %s316_s19 }
  0x18   :  { %v418_v12 = vld [vmem:[#allocation8 + $0x70] sm:$0xff]  ;;  %v417_v19 = vld [vmem:[#allocation8 + $0x68] sm:$0xff]  ;;  %v416_v22 = vld [vmem:[#allocation8 + $0x60] sm:$0xff] }
  0x19   :  { %v113_v13 = vsel %vm111_vm0, %v103_v6, 0  ;;  %v116_v14 = vsel %vm111_vm0, %v104_v7, 0  ;;  %v407_v23 = vld [vmem:[#allocation8 + $0x18] sm:$0xff]  ;;  %v406_v25 = vld [vmem:[#allocation8 + $0x10] sm:$0xff]  ;;  %v405_v27 = vld [vmem:[#allocation8 + $0x8] sm:$0xff] }
  0x1a   :  { %124 = vmatpush.bf16.msra.mxu0 %v113_v13  ;;  %137 = vmatpush.bf16.msra.mxu1 %v116_v14  ;;  %v415_v24 = vld [vmem:[#allocation8 + $0x58] sm:$0xff]  ;;  %v414_v26 = vld [vmem:[#allocation8 + $0x50] sm:$0xff]  ;;  %v413_v28 = vld [vmem:[#allocation8 + $0x48] sm:$0xff] }
  0x1b   :  { %277 = vmatpush.bf16.msra.mxu2 %v410_v11  ;;  %290 = vmatpush.bf16.msra.mxu3 %v418_v12  ;;  %v404_v29 = vld [vmem:[#allocation8] sm:$0xff]  ;;  %v86_v31 = vld [vmem:[#allocation7] sm:$0x3] }
  0x1c   :  { %v412_v30 = vld [vmem:[#allocation8 + $0x40] sm:$0xff]  ;;  %v88_v32 = vperm.slane %v86_v31, 0  ;;  %v89_v33 = vperm.slane %v86_v31, 1  ;;  %v429_v44 = vld [vmem:[%s619_s4] ss:$0 sm:$0xff] }
  0x1e   :  { %125 = vmatpush.bf16.msra.mxu0 %v331_v15  ;;  %138 = vmatpush.bf16.msra.mxu1 %v335_v16 }
  0x1f   :  { %278 = vmatpush.bf16.msra.mxu2 %v409_v18  ;;  %291 = vmatpush.bf16.msra.mxu3 %v417_v19 }
  0x21   :  { %336 = vmatmul.msk.bf16.vlgmr.msra.gmra.mxu0 %vm107_vm1, %v82_v20  ;;  %337 = vmatmul.msk.bf16.vlgmr.msra.gmra.mxu1 %vm107_vm1, %v82_v20 }
  0x23   :  { %279 = vmatpush.bf16.msra.mxu2 %v408_v21  ;;  %292 = vmatpush.bf16.msra.mxu3 %v416_v22 }
  0x27   :  { %280 = vmatpush.bf16.msra.mxu2 %v407_v23  ;;  %293 = vmatpush.bf16.msra.mxu3 %v415_v24 }
  0x2b   :  { %281 = vmatpush.bf16.msra.mxu2 %v406_v25  ;;  %294 = vmatpush.bf16.msra.mxu3 %v414_v26 }
  0x2f   :  { %282 = vmatpush.bf16.msra.mxu2 %v405_v27  ;;  %295 = vmatpush.bf16.msra.mxu3 %v413_v28 }
  0x33   :  { %283 = vmatpush.bf16.msra.mxu2 %v404_v29  ;;  %296 = vmatpush.bf16.msra.mxu3 %v412_v30 }
  0x9e   :  { %v127_v34 = vpop.f32.mrf.mxu0  ;;  %v140_v35 = vpop.f32.mrf.mxu1 }
  0x9f   :  { %v128_v36 = vadd.f32 %v127_v34, %v88_v32  ;;  %v141_v37 = vadd.f32 %v140_v35, %v89_v33 }
  0xa1   :  { %v144_v38 = vmax.f32 %v128_v36, 0.0  ;;  %v145_v39 = vmax.f32 %v141_v37, 0.0 }
  0xa3   :  { %v146_v40 = vpack.c.bf16 %v144_v38, %v144_v38  ;;  %v147_v41 = vpack.c.bf16 %v145_v39, %v145_v39 }
  0xa5   :  { %284 = vmatmul.bf16.vlgmr.msra.gmra.mxu2 %v146_v40  ;;  %297 = vmatmul.bf16.vlgmr.msra.gmra.mxu3 %v147_v41 }
  0xa6   :  { %v129_v42 = vpop.f32.mrf.mxu0  ;;  %v142_v43 = vpop.f32.mrf.mxu1 }
 0x128   :  { %v285_v45 = vpop.f32.mrf.mxu2  ;;  %v298_v46 = vpop.f32.mrf.mxu3 }
 0x129   :  { %v299_v47 = vadd.f32 %v298_v46, %v285_v45 }
 0x12b   :  { %v306_v48 = vadd.f32 %v429_v44, %v299_v47 }
 0x12d   :  { %308 = vst.msk [vmem:[#allocation10] sm:$0xff] %vm307_vm2, %v306_v48 }
 0x12e   :  { %319 = dma.vmem_to_hbm [thread:$0]  %s315_s16, 128, %s317_s19, [#allocation4]  }
 0x130   :  { %v287_v49 = vpop.f32.mrf.mxu2  ;;  %v300_v50 = vpop.f32.mrf.mxu3 }
 0x131   :  { %556 = dma.done.wait [#allocation4], 128  }
 0x132   :  { %557 = vsyncadd [#allocation4], 4294967168 }
 0x133   :  { %324 = vsyncpa [#allocation3], 1 }
 0x134   :  { %325 = vsyncpa [#allocation6], 1 }
 0x135   :  { %326 = vsyncpa [#allocation9], 1 }
 0x136   :  { %327 = vsyncpa [#allocation4], 1 }

</bundles_post_ra>
